<compile_context>
chip_gen: v6e
topology: v6e:2x2x1
jax: 0.10.0
libtpu: 0.0.40
codegen_flags: <defaults>
</compile_context>

<pallas_src>
import functools

import jax
import jax.numpy as jnp
from jax.experimental import pallas as pl
from jax.experimental.pallas import tpu as pltpu

_LANE = 128


def _round_up(x, m):
    return ((x + m - 1) // m) * m


def _make_actor_kernel(fc1_dim, fc2_dim, action_dim, seg_offsets):
    # 128-aligned static lane offsets into the packed [1, P] row:
    #   [ b1 | b2 | b3 | mid | half ]   (each segment zero-padded to 128 lanes)
    o_b1, o_b2, o_b3, o_mid, o_half = seg_offsets

    def kernel(obs_ref, w1_ref, w2_ref, w3_ref, pk_ref, out_ref):
        x = obs_ref[...].astype(jnp.bfloat16)        # (TB, obs_dim) batch tile

        b1 = pk_ref[:, o_b1:o_b1 + fc1_dim]          # [1, fc1]   (f32)
        b2 = pk_ref[:, o_b2:o_b2 + fc2_dim]          # [1, fc2]
        b3 = pk_ref[:, o_b3:o_b3 + action_dim]       # [1, act]
        mid = pk_ref[:, o_mid:o_mid + action_dim]    # (low+high)/2
        half = pk_ref[:, o_half:o_half + action_dim]  # (high-low)/2

        # Layer 1: bf16 x bf16 -> f32 accumulate (single MXU pass), f32 ReLU.
        h1 = jnp.dot(x, w1_ref[...], preferred_element_type=jnp.float32) + b1
        h1 = jnp.maximum(h1, 0.0)

        # Layer 2.
        h2 = jnp.dot(h1.astype(jnp.bfloat16), w2_ref[...],
                     preferred_element_type=jnp.float32) + b2
        h2 = jnp.maximum(h2, 0.0)

        # Layer 3 + bounded epilogue: out = mid + half * tanh(logits).
        logits = jnp.dot(h2.astype(jnp.bfloat16), w3_ref[...],
                         preferred_element_type=jnp.float32) + b3
        out_ref[...] = mid + half * jnp.tanh(logits)

    return kernel


@functools.partial(jax.jit, static_argnames=("block_batch",))
def actor_forward(obs, params, *, block_batch=4096):
    """Full actor MLP in one pallas_call.

    The batch is grid-tiled (streamed); weights and the packed bias/bounds row
    stay VMEM-resident across grid steps (constant index_maps -> no re-DMA).
    """
    batch, obs_dim = obs.shape
    fc1_dim = params["w1"].shape[1]
    fc2_dim = params["w2"].shape[1]
    action_dim = params["w3"].shape[1]
    packed = params["packed"]
    P = packed.shape[1]

    # Batch tile: multiple of 16 (bf16 sublane packing).  For batch >= 32 make
    # sure there are >= 2 grid steps so the "parallel" axis shards across both
    # TensorCores on v7x; tiny batches fall back to a single full-batch block.
    if batch <= 16:
        tb = batch
    else:
        tb = min(block_batch, batch)
        if tb == batch and batch >= 32:
            tb = -(-batch // 2)
        tb = max(16, (tb // 16) * 16)
    grid = (pl.cdiv(batch, tb),)

    # 128-aligned packed-row segment offsets.
    s1 = _round_up(fc1_dim, _LANE)
    s2 = _round_up(fc2_dim, _LANE)
    s3 = _round_up(action_dim, _LANE)
    seg_offsets = (0, s1, s1 + s2, s1 + s2 + s3, s1 + s2 + 2 * s3)
    assert P == s1 + s2 + 3 * s3

    kernel = _make_actor_kernel(fc1_dim, fc2_dim, action_dim, seg_offsets)

    # Rough lane-padded VMEM footprint -> explicit scoped-VMEM budget.
    def rpad(d):
        return _round_up(max(d, 1), _LANE)

    est = 2 * tb * 4 * (rpad(obs_dim) + rpad(action_dim))              # in/out (2-buf)
    est += tb * 4 * (rpad(fc1_dim) + rpad(fc2_dim) + rpad(action_dim))  # intermediates
    est += 2 * (obs_dim * rpad(fc1_dim) + fc1_dim * rpad(fc2_dim)
                + fc2_dim * rpad(action_dim))                           # bf16 weights
    est += 4 * P                                                        # packed row
    vmem_limit = int(min(max(2 * est, 16 << 20), 48 << 20))

    flops = 2 * batch * (obs_dim * fc1_dim + fc1_dim * fc2_dim
                         + fc2_dim * action_dim)
    weight_bytes = 2 * (obs_dim * fc1_dim + fc1_dim * fc2_dim
                        + fc2_dim * action_dim) + 4 * P
    bytes_accessed = 4 * batch * (obs_dim + action_dim) + weight_bytes

    return pl.pallas_call(
        kernel,
        out_shape=jax.ShapeDtypeStruct((batch, action_dim), jnp.float32),
        grid=grid,
        in_specs=[
            pl.BlockSpec((tb, obs_dim), lambda i: (i, 0)),          # streamed
            pl.BlockSpec((obs_dim, fc1_dim), lambda i: (0, 0)),     # resident
            pl.BlockSpec((fc1_dim, fc2_dim), lambda i: (0, 0)),     # resident
            pl.BlockSpec((fc2_dim, action_dim), lambda i: (0, 0)),  # resident
            pl.BlockSpec((1, P), lambda i: (0, 0)),                 # resident
        ],
        out_specs=pl.BlockSpec((tb, action_dim), lambda i: (i, 0)),
        compiler_params=pltpu.CompilerParams(
            dimension_semantics=("parallel",),
            vmem_limit_bytes=vmem_limit),
        cost_estimate=pl.CostEstimate(
            flops=flops,
            transcendentals=batch * action_dim,
            bytes_accessed=bytes_accessed),
    )(obs, params["w1"], params["w2"], params["w3"], packed)


def _orthogonal(key, shape, dtype=jnp.float32):
    # Deterministic orthogonal-style init (mimics torch.nn.init.orthogonal_).
    rows, cols = shape
    n = max(rows, cols)
    a = jax.random.normal(key, (n, n), dtype=jnp.float32)
    q, _ = jnp.linalg.qr(a)
    return q[:rows, :cols].astype(dtype)


def _pad_lanes(row, width):
    pad = width - row.shape[1]
    if pad:
        row = jnp.concatenate(
            [row, jnp.zeros((1, pad), jnp.float32)], axis=1)
    return row


def make_params(key, obs_dim, fc1_dim, fc2_dim, action_dim,
                action_low, action_high):
    k1, k2, k3, k4, k5, k6 = jax.random.split(key, 6)
    # Weights stored as [in_dim, out_dim] (transposed PyTorch nn.Linear weight),
    # in bf16 for single-pass MXU matmuls.
    w1 = _orthogonal(k1, (obs_dim, fc1_dim)).astype(jnp.bfloat16)
    w2 = _orthogonal(k2, (fc1_dim, fc2_dim)).astype(jnp.bfloat16)
    w3 = (0.01 * jax.random.normal(k3, (fc2_dim, action_dim),
                                   dtype=jnp.float32)).astype(jnp.bfloat16)
    b1 = 0.01 * jax.random.normal(k4, (1, fc1_dim), dtype=jnp.float32)
    b2 = 0.01 * jax.random.normal(k5, (1, fc2_dim), dtype=jnp.float32)
    b3 = 0.01 * jax.random.normal(k6, (1, action_dim), dtype=jnp.float32)
    low = jnp.asarray(action_low, dtype=jnp.float32).reshape(1, action_dim)
    high = jnp.asarray(action_high, dtype=jnp.float32).reshape(1, action_dim)
    mid = (low + high) * 0.5
    half = (high - low) * 0.5
    # Lane-dense packed row [b1 | b2 | b3 | mid | half], each segment padded to
    # a 128-lane boundary so in-kernel static slices are lane-tile aligned.
    s1 = _round_up(fc1_dim, _LANE)
    s2 = _round_up(fc2_dim, _LANE)
    s3 = _round_up(action_dim, _LANE)
    packed = jnp.concatenate([
        _pad_lanes(b1, s1), _pad_lanes(b2, s2), _pad_lanes(b3, s3),
        _pad_lanes(mid, s3), _pad_lanes(half, s3)], axis=1)
    return dict(w1=w1, b1=b1, w2=w2, b2=b2, w3=w3, b3=b3,
                low=low, high=high, packed=packed)


def actor_forward_ref(obs, p):
    # Pure-JAX reference matching the PyTorch forward, evaluated with the same
    # bf16-rounded operands the kernel feeds the MXU (f32 accumulation).
    def f32(x):
        return x.astype(jnp.float32)

    w1, w2, w3 = f32(p["w1"]), f32(p["w2"]), f32(p["w3"])
    x = f32(obs.astype(jnp.bfloat16))
    h1 = jnp.maximum(x @ w1 + p["b1"], 0.0)
    h2 = jnp.maximum(f32(h1.astype(jnp.bfloat16)) @ w2 + p["b2"], 0.0)
    coarse = jnp.tanh(f32(h2.astype(jnp.bfloat16)) @ w3 + p["b3"])
    return p["low"] + (p["high"] - p["low"]) / 2 * (coarse + 1.0)


if __name__ == "__main__":
    key = jax.random.PRNGKey(0)
    k_obs, k_params = jax.random.split(key)

    batch, obs_dim, fc1_dim, fc2_dim, action_dim = 64, 8, 32, 32, 2
    action_low = [-1.0, 0.0]
    action_high = [1.0, 2.0]

    params = make_params(k_params, obs_dim, fc1_dim, fc2_dim, action_dim,
                         action_low, action_high)
    obs = jax.random.normal(k_obs, (batch, obs_dim), dtype=jnp.float32)

    # Default block_batch: batch (64) < block_batch, so the wrapper splits the
    # batch into two 32-row blocks -> exercises the streamed grid + both-TC
    # path while the weights stay VMEM-resident.
    out = actor_forward(obs, params)
    out = jax.block_until_ready(out)

    ref = actor_forward_ref(obs, params)
    assert out.shape == (batch, action_dim)
    assert bool(jnp.allclose(out, ref, atol=2e-3, rtol=2e-3)), (
        f"max abs err = {float(jnp.max(jnp.abs(out - ref)))}")

    print("KERNEL_OK")
</pallas_src>

<mosaic_0001>
module attributes {stable_mosaic.version = 11 : i64} {
  func.func @kernel(%arg0: i32, %arg1: memref<32x8xf32, #tpu.memory_space<vmem>>, %arg2: memref<8x32xbf16, #tpu.memory_space<vmem>>, %arg3: memref<32x32xbf16, #tpu.memory_space<vmem>>, %arg4: memref<32x2xbf16, #tpu.memory_space<vmem>>, %arg5: memref<1x640xf32, #tpu.memory_space<vmem>>, %arg6: memref<32x2xf32, #tpu.memory_space<vmem>>) attributes {dimension_semantics = [#tpu.dimension_semantics<parallel>], iteration_bounds = array<i64: 2>, scalar_prefetch = 0 : i64, scratch_operands = 0 : i64, tpu.core_type = #tpu.core_type<tc>, window_params = [{transform_indices = @transform_0, window_bounds = array<i64: 32, 8>}, {pipeline_mode = #tpu.pipeline_mode<synchronous>, transform_indices = @transform_1, window_bounds = array<i64: 8, 32>}, {pipeline_mode = #tpu.pipeline_mode<synchronous>, transform_indices = @transform_2, window_bounds = array<i64: 32, 32>}, {pipeline_mode = #tpu.pipeline_mode<synchronous>, transform_indices = @transform_3, window_bounds = array<i64: 32, 2>}, {pipeline_mode = #tpu.pipeline_mode<synchronous>, transform_indices = @transform_4, window_bounds = array<i64: 1, 640>}, {transform_indices = @transform_5, window_bounds = array<i64: 32, 2>}]} {
    %c0 = arith.constant 0 : index
    %c0_0 = arith.constant 0 : index
    %0 = vector.load %arg1[%c0, %c0_0] : memref<32x8xf32, #tpu.memory_space<vmem>>, vector<32x8xf32>
    %1 = arith.truncf %0 : vector<32x8xf32> to vector<32x8xbf16>
    %c0_1 = arith.constant 0 : index
    %c0_2 = arith.constant 0 : index
    %2 = vector.load %arg5[%c0_1, %c0_2] : memref<1x640xf32, #tpu.memory_space<vmem>>, vector<1x32xf32>
    %c0_3 = arith.constant 0 : index
    %c128 = arith.constant 128 : index
    %3 = vector.load %arg5[%c0_3, %c128] : memref<1x640xf32, #tpu.memory_space<vmem>>, vector<1x32xf32>
    %c0_4 = arith.constant 0 : index
    %c256 = arith.constant 256 : index
    %4 = vector.load %arg5[%c0_4, %c256] : memref<1x640xf32, #tpu.memory_space<vmem>>, vector<1x2xf32>
    %c0_5 = arith.constant 0 : index
    %c384 = arith.constant 384 : index
    %5 = vector.load %arg5[%c0_5, %c384] : memref<1x640xf32, #tpu.memory_space<vmem>>, vector<1x2xf32>
    %c0_6 = arith.constant 0 : index
    %c512 = arith.constant 512 : index
    %6 = vector.load %arg5[%c0_6, %c512] : memref<1x640xf32, #tpu.memory_space<vmem>>, vector<1x2xf32>
    %c0_7 = arith.constant 0 : index
    %c0_8 = arith.constant 0 : index
    %7 = vector.load %arg2[%c0_7, %c0_8] : memref<8x32xbf16, #tpu.memory_space<vmem>>, vector<8x32xbf16>
    %cst = arith.constant dense<0.000000e+00> : vector<32x32xf32>
    %8 = tpu.matmul %1, %7, %cst {dimension_numbers = #tpu.dot_dimension_numbers<[1], [0], [0], [1], [0, 0, 1, 1], [], []>} : vector<32x8xbf16>, vector<8x32xbf16>, vector<32x32xf32> -> vector<32x32xf32>
    %9 = vector.broadcast %2 : vector<1x32xf32> to vector<32x32xf32>
    %10 = arith.addf %8, %9 : vector<32x32xf32>
    %cst_9 = arith.constant 0.000000e+00 : f32
    %11 = vector.broadcast %cst_9 : f32 to vector<32x32xf32>
    %12 = arith.maximumf %10, %11 : vector<32x32xf32>
    %13 = arith.truncf %12 : vector<32x32xf32> to vector<32x32xbf16>
    %c0_10 = arith.constant 0 : index
    %c0_11 = arith.constant 0 : index
    %14 = vector.load %arg3[%c0_10, %c0_11] : memref<32x32xbf16, #tpu.memory_space<vmem>>, vector<32x32xbf16>
    %cst_12 = arith.constant dense<0.000000e+00> : vector<32x32xf32>
    %15 = tpu.matmul %13, %14, %cst_12 {dimension_numbers = #tpu.dot_dimension_numbers<[1], [0], [0], [1], [0, 0, 1, 1], [], []>} : vector<32x32xbf16>, vector<32x32xbf16>, vector<32x32xf32> -> vector<32x32xf32>
    %16 = vector.broadcast %3 : vector<1x32xf32> to vector<32x32xf32>
    %17 = arith.addf %15, %16 : vector<32x32xf32>
    %cst_13 = arith.constant 0.000000e+00 : f32
    %18 = vector.broadcast %cst_13 : f32 to vector<32x32xf32>
    %19 = arith.maximumf %17, %18 : vector<32x32xf32>
    %20 = arith.truncf %19 : vector<32x32xf32> to vector<32x32xbf16>
    %c0_14 = arith.constant 0 : index
    %c0_15 = arith.constant 0 : index
    %21 = vector.load %arg4[%c0_14, %c0_15] : memref<32x2xbf16, #tpu.memory_space<vmem>>, vector<32x2xbf16>
    %cst_16 = arith.constant dense<0.000000e+00> : vector<32x2xf32>
    %22 = tpu.matmul %20, %21, %cst_16 {dimension_numbers = #tpu.dot_dimension_numbers<[1], [0], [0], [1], [0, 0, 1, 1], [], []>} : vector<32x32xbf16>, vector<32x2xbf16>, vector<32x2xf32> -> vector<32x2xf32>
    %23 = vector.broadcast %4 : vector<1x2xf32> to vector<32x2xf32>
    %24 = arith.addf %22, %23 : vector<32x2xf32>
    %25 = math.tanh %24 : vector<32x2xf32>
    %26 = vector.broadcast %6 : vector<1x2xf32> to vector<32x2xf32>
    %27 = arith.mulf %26, %25 : vector<32x2xf32>
    %28 = vector.broadcast %5 : vector<1x2xf32> to vector<32x2xf32>
    %29 = arith.addf %28, %27 : vector<32x2xf32>
    %c0_17 = arith.constant 0 : index
    %c0_18 = arith.constant 0 : index
    %30 = vector.load %arg6[%c0_17, %c0_18] : memref<32x2xf32, #tpu.memory_space<vmem>>, vector<32x2xf32>
    tpu.vector_store %arg6[%c0_17, %c0_18], %29 {strides = array<i32>} : memref<32x2xf32, #tpu.memory_space<vmem>>, vector<32x2xf32>,
    return
  }
  func.func @transform_0(%arg0: i32) -> (i32, i32) {
    %c0_i32 = arith.constant 0 : i32
    %c0_i32_0 = arith.constant 0 : i32
    return %arg0, %c0_i32 : i32, i32
  }
  func.func @transform_1(%arg0: i32) -> (i32, i32) {
    %c0_i32 = arith.constant 0 : i32
    %c0_i32_0 = arith.constant 0 : i32
    %c0_i32_1 = arith.constant 0 : i32
    return %c0_i32, %c0_i32_0 : i32, i32
  }
  func.func @transform_2(%arg0: i32) -> (i32, i32) {
    %c0_i32 = arith.constant 0 : i32
    %c0_i32_0 = arith.constant 0 : i32
    %c0_i32_1 = arith.constant 0 : i32
    return %c0_i32, %c0_i32_0 : i32, i32
  }
  func.func @transform_3(%arg0: i32) -> (i32, i32) {
    %c0_i32 = arith.constant 0 : i32
    %c0_i32_0 = arith.constant 0 : i32
    %c0_i32_1 = arith.constant 0 : i32
    return %c0_i32, %c0_i32_0 : i32, i32
  }
  func.func @transform_4(%arg0: i32) -> (i32, i32) {
    %c0_i32 = arith.constant 0 : i32
    %c0_i32_0 = arith.constant 0 : i32
    %c0_i32_1 = arith.constant 0 : i32
    return %c0_i32, %c0_i32_0 : i32, i32
  }
  func.func @transform_5(%arg0: i32) -> (i32, i32) {
    %c0_i32 = arith.constant 0 : i32
    %c0_i32_0 = arith.constant 0 : i32
    return %arg0, %c0_i32 : i32, i32
  }
}

</mosaic_0001>

<bundles_post_ra>
// kernel: actor_forward.1
= control target key start
LH: loop header
LB: loop body
LE: loop exit
PB: predicated region body
PF: predicated region fallthrough
CT: control target
= control target key end

     0   :  { %s677_s18 = smov 0   ;;  %s735_s0 = inlined_call_operand.vmem [shape: f32[64,8], index: 0, kind: input, shape index: {}]   ;;  %s736_s1 = inlined_call_operand.vmem [shape: bf16[8,32], index: 1, kind: input, shape index: {}]   ;;  %s737_s2 = inlined_call_operand.vmem [shape: bf16[32,32], index: 2, kind: input, shape index: {}]   ;;  %s738_s3 = inlined_call_operand.vmem [shape: bf16[32,2], index: 3, kind: input, shape index: {}]   ;;  %s739_s4 = inlined_call_operand.vmem [shape: f32[1,640], index: 4, kind: input, shape index: {}]   ;;  %s740_s5 = inlined_call_operand.vmem [shape: f32[64,2], index: 5, kind: output, shape index: {}]  }
   0x1 LB: > { %s559_s19 = sadd.s32 4294967295, %s645_s18   ;;  %p563_p0 = scmp.ge.s32.totalorder %s645_s18, 1  ;;  %s645_s18 = sphi %s677_s18, %s15_s18  }
   0x2   : > { %p188_p1 = scmp.lt.s32.totalorder %s645_s18, 3 }
   0x4   : > { %p189_p2 = pnand %p563_p0, %p188_p1 }
   0x5   : > { %s564_s22 = sshll.u32 (!%p189_p2), %s559_s19, 2 }
   0x6   : > { %192 = sbr.rel (%p189_p2) target bundleno = 650 (0x28a), region = 40  ;;  %p217_p3 = scmp.lt.s32.totalorder (!%p189_p2), %s564_s22, 7 }
   0xb   : > { %v240_v0 = vld [vmem:[%s736_s1] sm:$0xf]  ;;  %vm254_vm0 = vcmask 1043456   ;;  %s742_s22 = smov (!%p217_p3, %s564_s22), 7  ;;  %vm247_vm1 = vcmask 64512   ;;  %v627_v8 = vld [vmem:[%s737_s2 + $0x8] sm:$0xff]  }
   0xc   : > { %618 = vmatprep.subr.msk.bf16.mxu0 %vm254_vm0, %v240_v0  ;;  %v256_v1 = vsel %vm254_vm0, %v240_v0, 0  ;;  %s565_s23 = sshll.u32 %s742_s22, 3  ;;  %602 = vmatprep.subr.bf16.mxu1 %v627_v8  ;;  %v628_v9 = vld [vmem:[%s737_s2] sm:$0xff]   ;;  %vm335_vm2 = vcmask 261120   ;;  %v629_v25 = vld [vmem:[%s738_s3 + $0x8] sm:$0xff]   ;;  %vm498_vm3 = vcmask 15360  }
   0xd   : > { %597 = vmatpush3.bf16.msra.mxu0 %v256_v1  ;;  %s220_s26 = scalar_lea.vmem %s735_s0, %s565_s23  ;;  %603 = vmatpush3.bf16.msra.mxu1 %v627_v8  ;;  %v568_v12 = vld [vmem:[%s739_s4] ss:$0 sm:$0xff]  ;;  %v571_v29 = vld [vmem:[%s739_s4 + $0x1] ss:$0 sm:$0xff]  ;;  %v576_v42 = vld [vmem:[%s739_s4 + $0x2] ss:$0 sm:$0xff]  ;;  %s226_s21 = scalar_lea.vmem %s740_s5, %s565_s23 }
   0xe   : > { %v229_v2 = vld [vmem:[%s220_s26] sm:$0xff]  ;;  %v230_v3 = vld [vmem:[%s220_s26 + $0x8] sm:$0xff]  ;;  %v231_v4 = vld [vmem:[%s220_s26 + $0x10] sm:$0xff]  ;;  %604 = vmatprep.subr.bf16.mxu1 %v628_v9  ;;  %610 = vmatprep.subr.bf16.mxu0 %v629_v25 }
   0xf   : > { %v233_v5 = vpack.c.bf16 %v230_v3, %v229_v2  ;;  %v232_v6 = vld [vmem:[%s220_s26 + $0x18] sm:$0xff]  ;;  %v630_v26 = vld [vmem:[%s738_s3] sm:$0xff]  }
  0x10   : > { %v234_v7 = vpack.c.bf16 %v232_v6, %v231_v4  ;;  %v581_v52 = vld [vmem:[%s739_s4 + $0x4] ss:$0 sm:$0xff]  ;;  %v582_v56 = vld [vmem:[%s739_s4 + $0x3] ss:$0 sm:$0xff] }
  0x11   : > { %598 = vmatprep.mubr.msk.bf16.mxu0 %vm247_vm1, %v233_v5  ;;  %605 = vmatpush3.bf16.msra.mxu1 %v628_v9 }
  0x12   : > { %599 = vmatmul.mubr.msk.bf16.vlgmr.msra.gmra.mxu0 %vm247_vm1, %v234_v7 }
  0x13   : > { %611 = vmatpush3.bf16.msra.mxu0 %v629_v25 }
  0x14   : > { %612 = vmatprep.subr.bf16.mxu0 %v630_v26 }
  0x17   : > { %613 = vmatpush3.bf16.msra.mxu0 %v630_v26 }
  0xd2   : > { %v600_v10 = vpop.f32.mrf.mxu0 }
  0xd3   : > { %v301_v16 = vadd.f32 %v600_v10, %v568_v12 }
  0xd4   : > { %v292_v11 = vpop.f32.mrf.mxu0 }
  0xd5   : > { %v293_v14 = vadd.f32 %v568_v12, %v292_v11  ;;  %v309_v22 = vmax.f32 %v301_v16, 0.0 }
  0xd6   : > { %v601_v13 = vpop.f32.mrf.mxu0 }
  0xd7   : > { %v304_v15 = vadd.f32 %v601_v13, %v568_v12  ;;  %v307_v20 = vmax.f32 %v293_v14, 0.0 }
  0xd8   : > { %v295_v17 = vpop.f32.mrf.mxu0 }
  0xd9   : > { %v296_v18 = vadd.f32 %v568_v12, %v295_v17  ;;  %v310_v19 = vmax.f32 %v304_v15, 0.0 }
  0xdb   : > { %v308_v21 = vmax.f32 %v296_v18, 0.0  ;;  %v312_v24 = vpack.c.bf16 %v310_v19, %v309_v22 }
  0xdd   : > { %v311_v23 = vpack.c.bf16 %v308_v21, %v307_v20 }
  0xdf   : > { %606 = vmatprep.mubr.msk.bf16.mxu1 %vm335_vm2, %v311_v23 }
  0xe0   : > { %607 = vmatmul.mubr.msk.bf16.vlgmr.msra.gmra.mxu1 %vm335_vm2, %v312_v24 }
 0x1a0   : > { %v608_v27 = vpop.f32.mrf.mxu1 }
 0x1a1   : > { %v385_v33 = vadd.f32 %v608_v27, %v571_v29 }
 0x1a2   : > { %v376_v28 = vpop.f32.mrf.mxu1 }
 0x1a3   : > { %v377_v31 = vadd.f32 %v571_v29, %v376_v28  ;;  %v393_v39 = vmax.f32 %v385_v33, 0.0 }
 0x1a4   : > { %v609_v30 = vpop.f32.mrf.mxu1 }
 0x1a5   : > { %v388_v32 = vadd.f32 %v609_v30, %v571_v29  ;;  %v391_v37 = vmax.f32 %v377_v31, 0.0 }
 0x1a6   : > { %v379_v34 = vpop.f32.mrf.mxu1 }
 0x1a7   : > { %v380_v35 = vadd.f32 %v571_v29, %v379_v34  ;;  %v394_v36 = vmax.f32 %v388_v32, 0.0 }
 0x1a9   : > { %v392_v38 = vmax.f32 %v380_v35, 0.0  ;;  %v396_v41 = vpack.c.bf16 %v394_v36, %v393_v39 }
 0x1ab   : > { %v395_v40 = vpack.c.bf16 %v392_v38, %v391_v37 }
 0x1ad   : > { %614 = vmatprep.mubr.msk.bf16.mxu0 %vm335_vm2, %v395_v40 }
 0x1ae   : > { %615 = vmatmul.mubr.msk.bf16.vlgmr.msra.gmra.mxu0 %vm335_vm2, %v396_v41 }
 0x26e   : > { %v616_v43 = vpop.f32.mrf.mxu0 }
 0x26f   : > { %v468_v44 = vadd.f32 %v616_v43, %v576_v42 }
 0x270   : > { %v459_v45 = vpop.f32.mrf.mxu0 }
 0x271   : > { %v460_v46 = vadd.f32 %v576_v42, %v459_v45 }
 0x272   : > { %v617_v47 = vpop.f32.mrf.mxu0 }
 0x273   : > { %631 = vtanh.f32 %v460_v46  ;;  %v471_v48 = vadd.f32 %v617_v47, %v576_v42 }
 0x274   : > { %633 = vtanh.f32 %v468_v44  ;;  %v462_v49 = vpop.f32.mrf.mxu0 }
 0x275   : > { %635 = vtanh.f32 %v471_v48  ;;  %v463_v50 = vadd.f32 %v576_v42, %v462_v49 }
 0x277   : > { %637 = vtanh.f32 %v463_v50 }
 0x280   : > { %v632_v51 = vpop.eup %631 }
 0x281   : > { %v634_v53 = vpop.eup %633  ;;  %v484_v54 = vmul.f32 %v632_v51, %v581_v52 }
 0x282   : > { %v636_v55 = vpop.eup %635  ;;  %v486_v59 = vmul.f32 %v634_v53, %v581_v52 }
 0x283   : > { %v494_v57 = vadd.f32 %v582_v56, %v484_v54  ;;  %v487_v60 = vmul.f32 %v636_v55, %v581_v52 }
 0x284   : > { %v638_v58 = vpop.eup %637  ;;  %v496_v63 = vadd.f32 %v582_v56, %v486_v59 }
 0x285   : > { %499 = vst.msk [vmem:[%s226_s21] sm:$0xff] %vm498_vm3, %v494_v57  ;;  %v485_v61 = vmul.f32 %v638_v58, %v581_v52  ;;  %v497_v0 = vadd.f32 %v582_v56, %v487_v60 }
 0x286   : > { %501 = vst.msk [vmem:[%s226_s21 + $0x10] sm:$0xff] %vm498_vm3, %v496_v63 }
 0x287   : > { %v495_v62 = vadd.f32 %v582_v56, %v485_v61  ;;  %502 = vst.msk [vmem:[%s226_s21 + $0x18] sm:$0xff] %vm498_vm3, %v497_v0 }
 0x289   : > { %500 = vst.msk [vmem:[%s226_s21 + $0x8] sm:$0xff] %vm498_vm3, %v495_v62 }
 0x28a PF: > { %s15_s18 = sadd.s32 1, %s645_s18  }
 0x28b   : > { %p12_p4 = scmp.ge.s32.totalorder %s15_s18, 4  }
 0x28d   :  { %14 = sbr.rel (!%p12_p4) target bundleno = 1 (0x1), region = 70 }

</bundles_post_ra>
